<compile_context>
chip_gen: v5e
topology: v5e:2x2
jax: 0.10.0
libtpu: 0.0.40
codegen_flags: <defaults>
</compile_context>

<pallas_src>
import jax
import jax.numpy as jnp
from jax import lax
from jax.experimental import pallas as pl
from jax.experimental.pallas import tpu as pltpu


def _round_up(n, m):
    return ((n + m - 1) // m) * m


def mlp_policy_kernel(x_ref, w0_ref, w1t_ref, o_ref):
    """One batch tile: x (TB, D_in) -> o (D_out, TB) (lane-dense, batch on lanes)."""
    x = x_ref[...]                    # (TB, D_in), batch on sublanes (natural HBM layout)
    w0 = w0_ref[...]                  # (H, D_in), torch nn.Linear layout

    # Layer 0 on the MXU: hT = w0 @ x^T, contracting in_features of both
    # operands (rhs consumed transposed; no materialized transpose anywhere).
    h_t = lax.dot_general(
        w0, x, (((1,), (1,)), ((), ())),
        preferred_element_type=jnp.float32)              # (H, TB)
    h_t = jnp.maximum(h_t, 0.0)                          # ReLU (VPU)

    # Layer 1 on the VPU/XLU: for each (tiny) output feature, sublane-broadcast
    # the weight column and reduce over the hidden (sublane) axis.
    w1t = w1t_ref[...]                                   # (H, D_out)
    d_out = o_ref.shape[0]
    for o in range(d_out):                               # static unroll, D_out is tiny
        col = w1t[:, o:o + 1]                            # (H, 1)
        y_t = jnp.sum(h_t * col, axis=0, keepdims=True)  # (1, TB), sublane reduce (XLU)
        o_ref[pl.ds(o, 1), :] = jnp.tanh(y_t)            # Tanh (EUP) + lane-dense store


def mlp_policy_forward(x, w0, w1, *, tile_batch=2048):
    """Fused MLPPolicy forward.

    x:  (B, D_in) or (D_in,)   (cast to f32, 1-D input unsqueezed like PyTorch)
    w0: (H, D_in)   torch nn.Linear layout (out_features, in_features)
    w1: (D_out, H)  torch nn.Linear layout
    returns (B, D_out) float32 (or (1, D_out) for 1-D input, same as the module).
    """
    x = jnp.asarray(x, jnp.float32)
    if x.ndim == 1:
        x = x[None, :]
    w0 = jnp.asarray(w0, jnp.float32)
    w1 = jnp.asarray(w1, jnp.float32)

    b, d_in = x.shape
    h_dim, d_in_w = w0.shape
    d_out, h_dim_w = w1.shape
    assert d_in == d_in_w and h_dim == h_dim_w

    # Batch tiling: one full tile for small B (rounded to a sublane multiple),
    # otherwise fixed tiles (multiple of 8 for sublanes and of 128 so the
    # lane-dense output blocks tile legally across the grid).
    if b <= tile_batch:
        tb = _round_up(b, 8)
        b_pad = tb
    else:
        tb = tile_batch
        b_pad = _round_up(b, tb)
    if b_pad != b:
        x = jnp.pad(x, ((0, b_pad - b), (0, 0)))  # zero rows -> tanh(0)=0, sliced off below

    # (H, D_out): puts each output feature's weights along sublanes so the
    # kernel's broadcast-multiply needs no in-kernel relayout.  O(H*D_out)
    # elements -> negligible (a free reshape for D_out == 1).
    w1t = jnp.transpose(w1)

    out = pl.pallas_call(
        mlp_policy_kernel,
        out_shape=jax.ShapeDtypeStruct((d_out, b_pad), jnp.float32),
        grid=(b_pad // tb,),
        in_specs=[
            pl.BlockSpec((tb, d_in), lambda i: (i, 0)),       # x batch tile
            pl.BlockSpec((h_dim, d_in), lambda i: (0, 0)),    # w0, VMEM-resident
            pl.BlockSpec((h_dim, d_out), lambda i: (0, 0)),   # w1^T, VMEM-resident
        ],
        out_specs=pl.BlockSpec((d_out, tb), lambda i: (0, i)),  # lane-dense output
        compiler_params=pltpu.CompilerParams(
            dimension_semantics=("parallel",)),               # 2x on v7x (2 TCs)
    )(x, w0, w1t)

    return jnp.transpose(out[:, :b])  # back to (B, D_out)


if __name__ == "__main__":
    # Module defaults: dim_x=5, dim_h=16 (single hidden layer), dim_y=1,
    # activations=[ReLU, Tanh], use_bias=False, discrete=False.
    INPUT_DIM = 5
    HID_DIM = 16
    ACTION_DIM = 1
    BATCH = 4

    key = jax.random.PRNGKey(0)
    kx, k0, k1, kx2 = jax.random.split(key, 4)

    # Deterministic synthetic params in torch nn.Linear layout (out, in),
    # scaled like torch's default uniform(-1/sqrt(fan_in), 1/sqrt(fan_in)).
    w0 = jax.random.uniform(k0, (HID_DIM, INPUT_DIM), jnp.float32,
                            minval=-1.0, maxval=1.0) / jnp.sqrt(INPUT_DIM)
    w1 = jax.random.uniform(k1, (ACTION_DIM, HID_DIM), jnp.float32,
                            minval=-1.0, maxval=1.0) / jnp.sqrt(HID_DIM)

    def ref_forward(xx):
        return jnp.tanh(jnp.maximum(xx @ w0.T, 0.0) @ w1.T)

    # Small batch (exercises the pad-to-8, single-tile path).
    x = jax.random.normal(kx, (BATCH, INPUT_DIM), jnp.float32)
    y = jax.block_until_ready(mlp_policy_forward(x, w0, w1))
    assert y.shape == (BATCH, ACTION_DIM)
    assert jnp.allclose(y, ref_forward(x), atol=1e-5, rtol=1e-5)

    # Larger ragged batch with a small explicit tile size (exercises the
    # multi-tile "parallel" grid path and the pad-then-slice logic).
    x2 = jax.random.normal(kx2, (1543, INPUT_DIM), jnp.float32)
    y2 = jax.block_until_ready(mlp_policy_forward(x2, w0, w1, tile_batch=512))
    assert y2.shape == (1543, ACTION_DIM)
    assert jnp.allclose(y2, ref_forward(x2), atol=1e-5, rtol=1e-5)

    print("KERNEL_OK")
</pallas_src>

<mosaic_0001>
module attributes {stable_mosaic.version = 11 : i64} {
  func.func @mlp_policy_kernel(%arg0: i32, %arg1: memref<8x5xf32, #tpu.memory_space<vmem>>, %arg2: memref<16x5xf32, #tpu.memory_space<vmem>>, %arg3: memref<16x1xf32, #tpu.memory_space<vmem>>, %arg4: memref<1x8xf32, #tpu.memory_space<vmem>>) attributes {dimension_semantics = [#tpu.dimension_semantics<parallel>], iteration_bounds = array<i64: 1>, scalar_prefetch = 0 : i64, scratch_operands = 0 : i64, tpu.core_type = #tpu.core_type<tc>, window_params = [{transform_indices = @transform_0, window_bounds = array<i64: 8, 5>}, {pipeline_mode = #tpu.pipeline_mode<synchronous>, transform_indices = @transform_1, window_bounds = array<i64: 16, 5>}, {pipeline_mode = #tpu.pipeline_mode<synchronous>, transform_indices = @transform_2, window_bounds = array<i64: 16, 1>}, {transform_indices = @transform_3, window_bounds = array<i64: 1, 8>}]} {
    %c0 = arith.constant 0 : index
    %c0_0 = arith.constant 0 : index
    %0 = vector.load %arg1[%c0, %c0_0] : memref<8x5xf32, #tpu.memory_space<vmem>>, vector<8x5xf32>
    %c0_1 = arith.constant 0 : index
    %c0_2 = arith.constant 0 : index
    %1 = vector.load %arg2[%c0_1, %c0_2] : memref<16x5xf32, #tpu.memory_space<vmem>>, vector<16x5xf32>
    %cst = arith.constant dense<0.000000e+00> : vector<16x8xf32>
    %2 = tpu.matmul %1, %0, %cst {dimension_numbers = #tpu.dot_dimension_numbers<[1], [1], [0], [0], [0, 0, 1, 0], [], []>} : vector<16x5xf32>, vector<8x5xf32>, vector<16x8xf32> -> vector<16x8xf32>
    %cst_3 = arith.constant 0.000000e+00 : f32
    %3 = vector.broadcast %cst_3 : f32 to vector<16x8xf32>
    %4 = arith.maximumf %2, %3 : vector<16x8xf32>
    %c0_4 = arith.constant 0 : index
    %c0_5 = arith.constant 0 : index
    %5 = vector.load %arg3[%c0_4, %c0_5] : memref<16x1xf32, #tpu.memory_space<vmem>>, vector<16x1xf32>
    %6 = vector.broadcast %5 : vector<16x1xf32> to vector<16x8xf32>
    %7 = arith.mulf %4, %6 : vector<16x8xf32>
    %cst_6 = arith.constant dense<0.000000e+00> : vector<8xf32>
    %8 = vector.multi_reduction <add>, %7, %cst_6 [0] : vector<16x8xf32> to vector<8xf32>
    %9 = vector.shape_cast %8 : vector<8xf32> to vector<1x8xf32>
    %10 = math.tanh %9 : vector<1x8xf32>
    %c0_7 = arith.constant 0 : index
    %c0_8 = arith.constant 0 : index
    %11 = vector.load %arg4[%c0_7, %c0_8] : memref<1x8xf32, #tpu.memory_space<vmem>>, vector<1x8xf32>
    tpu.vector_store %arg4[%c0_7, %c0_8], %10 {strides = array<i32>} : memref<1x8xf32, #tpu.memory_space<vmem>>, vector<1x8xf32>,
    return
  }
  func.func @transform_0(%arg0: i32) -> (i32, i32) {
    %c0_i32 = arith.constant 0 : i32
    %c0_i32_0 = arith.constant 0 : i32
    return %arg0, %c0_i32 : i32, i32
  }
  func.func @transform_1(%arg0: i32) -> (i32, i32) {
    %c0_i32 = arith.constant 0 : i32
    %c0_i32_0 = arith.constant 0 : i32
    %c0_i32_1 = arith.constant 0 : i32
    return %c0_i32, %c0_i32_0 : i32, i32
  }
  func.func @transform_2(%arg0: i32) -> (i32, i32) {
    %c0_i32 = arith.constant 0 : i32
    %c0_i32_0 = arith.constant 0 : i32
    %c0_i32_1 = arith.constant 0 : i32
    return %c0_i32, %c0_i32_0 : i32, i32
  }
  func.func @transform_3(%arg0: i32) -> (i32, i32) {
    %c0_i32 = arith.constant 0 : i32
    %c0_i32_0 = arith.constant 0 : i32
    return %c0_i32, %arg0 : i32, i32
  }
}

</mosaic_0001>

<bundles_post_ra>
// kernel: tpu_custom_call.1
= control target key start
LH: loop header
LB: loop body
LE: loop exit
PB: predicated region body
PF: predicated region fallthrough
CT: control target
= control target key end

     0   :  { %vm18_vm0 = vcmask 39936   ;;  %v131_v2 = vmov 0   ;;  %s171_s0 = inlined_call_operand.vmem [shape: f32[8,5], index: 0, kind: input, shape index: {}]   ;;  %s172_s1 = inlined_call_operand.vmem [shape: f32[16,5], index: 1, kind: input, shape index: {}]   ;;  %s173_s2 = inlined_call_operand.vmem [shape: f32[16,1], index: 2, kind: input, shape index: {}]   ;;  %s174_s3 = inlined_call_operand.hbm [shape: f32[1,8], index: 3, kind: output, shape index: {}]  }
   0x1   :  { %v15_v0 = vld [vmem:[%s171_s0] sm:$0xff]  ;;  %102 = vset.pattern.permute.xlu0 %v131_v2 }
   0x2   :  { %v53_v1 = vld [vmem:[%s173_s2] sm:$0xff]  ;;  %96 = vmatpush.xpose.msk.msra.mxu0 %vm18_vm0, %v15_v0 }
   0x3   :  { %v16_v3 = vld [vmem:[%s172_s1] sm:$0xff] }
   0x4   :  { %8 = vsyncpa [#allocation3], 0  ;;  %99 = vmatpush.xpose.msk.msra.mxu1 %vm18_vm0, %v15_v0  ;;  %57 = vperm.xlu0 %102, %v53_v1   ;;  %v17_v4 = vld [vmem:[%s172_s1 + $0x8] sm:$0xff]  ;;  %vm67_vm1 = vcmask 64512   ;;  %s132_s1 = smov [#allocation2]   ;;  %s87_s23 = sshll.u32 %s174_s3, 4  ;;  %s88_s23 = int_to_ptr.hbm [resolvable:$true] %s87_s23 }
   0x5   :  { %97 = vmatmul.msk.f32.vlgmr.msra.gmra.mxu0 %vm18_vm0, %v16_v3  ;;  %v54_v5 = vld [vmem:[%s173_s2 + $0x8] sm:$0xff]  ;;  %s85_s2 = sshll.u32 %s132_s1, 4  ;;  %vm78_vm2 = vcmask 57344   ;;  %s86_s2 = int_to_ptr.vmem [resolvable:$true] %s85_s2 }
   0x7   :  { %98 = vmatmul.msk.f32.vlgmr.msra.gmra.mxu1 %vm18_vm0, %v17_v4 }
   0xc   :  { %62 = vperm.xlu0 %102, %v54_v5  }
  0x76   :  { %v58_v6 = vpop.permute.xlu0 %57 }
  0x7e   :  { %v63_v11 = vpop.permute.xlu0 %62 }
  0x82   :  { %v45_v7 = vpop.f32.mrf.mxu0 }
  0x83   :  { %v51_v8 = vmax.f32 %v45_v7, 0.0 }
  0x84   :  { %v48_v9 = vpop.f32.mrf.mxu1 }
  0x85   :  { %v52_v10 = vmax.f32 %v48_v9, 0.0  ;;  %v65_v12 = vmul.f32 %v58_v6, %v51_v8 }
  0x87   :  { %v66_v13 = vmul.f32 %v63_v11, %v52_v10  ;;  %v68_v14 = vsel %vm67_vm1, %v65_v12, 0.0 }
  0x89   :  { %v69_v15 = vsel %vm67_vm1, %v66_v13, 0.0 }
  0x8a   :  { %v70_v16 = vadd.f32 %v69_v15, %v68_v14 }
  0x8c   :  { %v71_v17 = vrot.slane %v70_v16, 4 }
  0x8e   :  { %v72_v18 = vadd.f32 %v71_v17, %v70_v16 }
  0x90   :  { %v73_v19 = vrot.slane %v72_v18, 2 }
  0x92   :  { %v74_v20 = vadd.f32 %v73_v19, %v72_v18 }
  0x94   :  { %v75_v21 = vrot.slane %v74_v20, 1 }
  0x96   :  { %v76_v22 = vadd.f32 %v75_v21, %v74_v20 }
  0x98   :  { %103 = vtanh.f32 %v76_v22 }
  0x9e   :  { %v104_v23 = vpop.eup %103 }
  0x9f   :  { %79 = vst.msk [vmem:[#allocation2] sm:$0x1] %vm78_vm2, %v104_v23 }
  0xa0   :  { %90 = dma.vmem_to_hbm [thread:$0]  %s86_s2, 16, %s88_s23, [#allocation3]  }
  0xa1   :  { %129 = dma.done.wait [#allocation3], 16  }
  0xa2   :  { %130 = vsyncadd [#allocation3], 4294967280 }
  0xa3   :  { %95 = vsyncpa [#allocation3], 1 }

</bundles_post_ra>
